<compile_context>
chip_gen: v7x
topology: tpu7x:2x2x1
jax: 0.10.0
libtpu: 0.0.40
codegen_flags: <defaults>
</compile_context>

<pallas_src>
import jax
import jax.numpy as jnp
from jax.experimental import pallas as pl
from jax.experimental.pallas import tpu as pltpu


def _cil_kernel(f1_ref, f2_ref, prm_ref, p_ref, out_ref, lhs_ref):
    M = f1_ref.shape[0]
    C = prm_ref.shape[0]
    Mp = lhs_ref.shape[0] - C          # image-row slab padded to a sublane (8) multiple

    # Build the stacked LHS [Mp + C, D]:
    #   rows [0, M)        = fused image features (f1 + f2)   (the *0.5 is a no-op after L2 norm)
    #   rows [M, Mp)       = zero padding (projections discarded)
    #   rows [Mp, Mp + C)  = prompt features
    lhs_ref[0:M, :] = f1_ref[...] + f2_ref[...]
    if Mp > M:                          # static at trace time
        lhs_ref[M:Mp, :] = jnp.zeros((Mp - M, lhs_ref.shape[1]), dtype=lhs_ref.dtype)
    lhs_ref[Mp:Mp + C, :] = prm_ref[...]

    # Single fused projection through feats_p (one MXU weight pass for both operand sets).
    proj = jnp.dot(lhs_ref[...], p_ref[...], preferred_element_type=jnp.float32)
    img = proj[0:M, :]                 # aligned offset 0
    prm = proj[Mp:Mp + C, :]           # aligned offset (multiple of 8)

    # Row-wise L2 normalization via rsqrt (EUP — free alongside MXU/VPU work).
    img = img * jax.lax.rsqrt(jnp.sum(img * img, axis=-1, keepdims=True))
    prm = prm * jax.lax.rsqrt(jnp.sum(prm * prm, axis=-1, keepdims=True))

    # logits[m, c] = <img[m], prm[c]>  — contract last dims directly (no transpose relayout).
    logits = jax.lax.dot_general(
        img, prm,
        dimension_numbers=(((1,), (1,)), ((), ())),
        preferred_element_type=jnp.float32,
    )

    # Final row-normalize of the logits (per image row, over classes).
    logits = logits * jax.lax.rsqrt(jnp.sum(logits * logits, axis=-1, keepdims=True))
    out_ref[...] = logits.astype(out_ref.dtype)


def fewshot_cil_worn2_forward(img_feat1, img_feat2, prompts_feats, feats_p):
    """Pallas implementation of FewShotCILwoRn2.forward (use_dpa=True, use_norm=True,
    ablate_vl=False, feats_p is not None, p_mask=3), starting from the adapter outputs."""
    M, D = img_feat1.shape
    C, D2 = prompts_feats.shape
    assert D == D2 and feats_p.shape == (D, D) and img_feat2.shape == (M, D)
    Mp = ((M + 7) // 8) * 8            # pad image rows so the prompt slab starts tile-aligned

    flops = 2 * (Mp + C) * D * D + 2 * M * C * D
    bytes_accessed = 4 * (2 * M * D + C * D + D * D + M * C)

    vmem = pl.BlockSpec(memory_space=pltpu.MemorySpace.VMEM)
    return pl.pallas_call(
        _cil_kernel,
        out_shape=jax.ShapeDtypeStruct((M, C), jnp.float32),
        in_specs=[vmem, vmem, vmem, vmem],
        out_specs=vmem,
        scratch_shapes=[pltpu.VMEM((Mp + C, D), jnp.float32)],
        cost_estimate=pl.CostEstimate(
            flops=flops, transcendentals=0, bytes_accessed=bytes_accessed),
    )(img_feat1, img_feat2, prompts_feats, feats_p)


def _reference(img_feat1, img_feat2, prompts_feats, feats_p):
    img = (img_feat1 + img_feat2) * 0.5
    img = img @ feats_p
    prm = prompts_feats @ feats_p
    img = img / jnp.linalg.norm(img, axis=-1, keepdims=True)
    prm = prm / jnp.linalg.norm(prm, axis=-1, keepdims=True)
    logits = img @ prm.T
    return logits / jnp.linalg.norm(logits, axis=-1, keepdims=True)


if __name__ == "__main__":
    clip_out_dim = 512          # dim_img == dim_prompt == clip_out_dim
    M = 2                       # number of (batch) image feature rows after the adapters
    C = 8                       # number of classes (prompt rows)

    key = jax.random.PRNGKey(0)
    k1, k2, k3, k4 = jax.random.split(key, 4)
    img_feat1 = jax.random.normal(k1, (M, clip_out_dim), dtype=jnp.float32)
    img_feat2 = jax.random.normal(k2, (M, clip_out_dim), dtype=jnp.float32)
    prompts_feats = jax.random.normal(k3, (C, clip_out_dim), dtype=jnp.float32)
    # deterministic synthetic projection matrix (stands in for the provided feats_p argument)
    feats_p = jax.random.normal(k4, (clip_out_dim, clip_out_dim), dtype=jnp.float32)
    feats_p = feats_p * (1.0 / jnp.sqrt(jnp.float32(clip_out_dim)))

    logits = fewshot_cil_worn2_forward(img_feat1, img_feat2, prompts_feats, feats_p)
    jax.block_until_ready(logits)

    ref = _reference(img_feat1, img_feat2, prompts_feats, feats_p)
    assert logits.shape == (M, C)
    assert jnp.allclose(logits, ref, atol=1e-4, rtol=1e-4)
    print("KERNEL_OK")
</pallas_src>

<mosaic_0001>
module attributes {stable_mosaic.version = 11 : i64} {
  func.func @_cil_kernel(%arg0: memref<2x512xf32, #tpu.memory_space<vmem>>, %arg1: memref<2x512xf32, #tpu.memory_space<vmem>>, %arg2: memref<8x512xf32, #tpu.memory_space<vmem>>, %arg3: memref<512x512xf32, #tpu.memory_space<vmem>>, %arg4: memref<2x8xf32, #tpu.memory_space<vmem>>, %arg5: memref<16x512xf32, #tpu.memory_space<vmem>>) attributes {dimension_semantics = [], scalar_prefetch = 0 : i64, scratch_operands = 1 : i64, tpu.core_type = #tpu.core_type<tc>} {
    %c0 = arith.constant 0 : index
    %c0_0 = arith.constant 0 : index
    %0 = vector.load %arg0[%c0, %c0_0] : memref<2x512xf32, #tpu.memory_space<vmem>>, vector<2x512xf32>
    %c0_1 = arith.constant 0 : index
    %c0_2 = arith.constant 0 : index
    %1 = vector.load %arg1[%c0_1, %c0_2] : memref<2x512xf32, #tpu.memory_space<vmem>>, vector<2x512xf32>
    %2 = arith.addf %0, %1 : vector<2x512xf32>
    %c0_3 = arith.constant 0 : index
    %c0_4 = arith.constant 0 : index
    %3 = vector.load %arg5[%c0_3, %c0_4] : memref<16x512xf32, #tpu.memory_space<vmem>>, vector<2x512xf32>
    tpu.vector_store %arg5[%c0_3, %c0_4], %2 {strides = array<i32>} : memref<16x512xf32, #tpu.memory_space<vmem>>, vector<2x512xf32>,
    %cst = arith.constant 0.000000e+00 : f32
    %4 = vector.broadcast %cst : f32 to vector<6x512xf32>
    %c2 = arith.constant 2 : index
    %c0_5 = arith.constant 0 : index
    %5 = vector.load %arg5[%c2, %c0_5] : memref<16x512xf32, #tpu.memory_space<vmem>>, vector<6x512xf32>
    tpu.vector_store %arg5[%c2, %c0_5], %4 {strides = array<i32>} : memref<16x512xf32, #tpu.memory_space<vmem>>, vector<6x512xf32>,
    %c0_6 = arith.constant 0 : index
    %c0_7 = arith.constant 0 : index
    %6 = vector.load %arg2[%c0_6, %c0_7] : memref<8x512xf32, #tpu.memory_space<vmem>>, vector<8x512xf32>
    %c8 = arith.constant 8 : index
    %c0_8 = arith.constant 0 : index
    %7 = vector.load %arg5[%c8, %c0_8] : memref<16x512xf32, #tpu.memory_space<vmem>>, vector<8x512xf32>
    tpu.vector_store %arg5[%c8, %c0_8], %6 {strides = array<i32>} : memref<16x512xf32, #tpu.memory_space<vmem>>, vector<8x512xf32>,
    %c0_9 = arith.constant 0 : index
    %c0_10 = arith.constant 0 : index
    %8 = vector.load %arg5[%c0_9, %c0_10] : memref<16x512xf32, #tpu.memory_space<vmem>>, vector<16x512xf32>
    %c0_11 = arith.constant 0 : index
    %c0_12 = arith.constant 0 : index
    %9 = vector.load %arg3[%c0_11, %c0_12] : memref<512x512xf32, #tpu.memory_space<vmem>>, vector<512x512xf32>
    %cst_13 = arith.constant dense<0.000000e+00> : vector<16x512xf32>
    %10 = tpu.matmul %8, %9, %cst_13 {dimension_numbers = #tpu.dot_dimension_numbers<[1], [0], [0], [1], [0, 0, 1, 1], [], []>} : vector<16x512xf32>, vector<512x512xf32>, vector<16x512xf32> -> vector<16x512xf32>
    %11 = vector.extract_strided_slice %10 {offsets = [0, 0], sizes = [2, 512], strides = [1, 1]} : vector<16x512xf32> to vector<2x512xf32>
    %12 = vector.extract_strided_slice %10 {offsets = [8, 0], sizes = [8, 512], strides = [1, 1]} : vector<16x512xf32> to vector<8x512xf32>
    %13 = arith.mulf %11, %11 : vector<2x512xf32>
    %cst_14 = arith.constant dense<0.000000e+00> : vector<2xf32>
    %14 = vector.multi_reduction <add>, %13, %cst_14 [1] : vector<2x512xf32> to vector<2xf32>
    %15 = vector.shape_cast %14 : vector<2xf32> to vector<2x1xf32>
    %16 = math.rsqrt %15 : vector<2x1xf32>
    %17 = vector.broadcast %16 : vector<2x1xf32> to vector<2x512xf32>
    %18 = arith.mulf %11, %17 : vector<2x512xf32>
    %19 = arith.mulf %12, %12 : vector<8x512xf32>
    %cst_15 = arith.constant dense<0.000000e+00> : vector<8xf32>
    %20 = vector.multi_reduction <add>, %19, %cst_15 [1] : vector<8x512xf32> to vector<8xf32>
    %21 = vector.shape_cast %20 : vector<8xf32> to vector<8x1xf32>
    %22 = math.rsqrt %21 : vector<8x1xf32>
    %23 = vector.broadcast %22 : vector<8x1xf32> to vector<8x512xf32>
    %24 = arith.mulf %12, %23 : vector<8x512xf32>
    %cst_16 = arith.constant dense<0.000000e+00> : vector<2x8xf32>
    %25 = tpu.matmul %18, %24, %cst_16 {dimension_numbers = #tpu.dot_dimension_numbers<[1], [1], [0], [0], [0, 0, 1, 0], [], []>} : vector<2x512xf32>, vector<8x512xf32>, vector<2x8xf32> -> vector<2x8xf32>
    %26 = arith.mulf %25, %25 : vector<2x8xf32>
    %cst_17 = arith.constant dense<0.000000e+00> : vector<2xf32>
    %27 = vector.multi_reduction <add>, %26, %cst_17 [1] : vector<2x8xf32> to vector<2xf32>
    %28 = vector.shape_cast %27 : vector<2xf32> to vector<2x1xf32>
    %29 = math.rsqrt %28 : vector<2x1xf32>
    %30 = vector.broadcast %29 : vector<2x1xf32> to vector<2x8xf32>
    %31 = arith.mulf %25, %30 : vector<2x8xf32>
    %c0_18 = arith.constant 0 : index
    %c0_19 = arith.constant 0 : index
    %32 = vector.load %arg4[%c0_18, %c0_19] : memref<2x8xf32, #tpu.memory_space<vmem>>, vector<2x8xf32>
    tpu.vector_store %arg4[%c0_18, %c0_19], %31 {strides = array<i32>} : memref<2x8xf32, #tpu.memory_space<vmem>>, vector<2x8xf32>,
    return
  }
}

</mosaic_0001>

<bundles_post_ra>
// kernel: tpu_custom_call.1
= control target key start
LH: loop header
LB: loop body
LE: loop exit
PB: predicated region body
PF: predicated region fallthrough
CT: control target
= control target key end

     0   :  { %9 = vsyncpa [#allocation4], 0  ;;  %s1391_s0 = inlined_call_operand.hbm [shape: f32[2,512], index: 0, kind: input, shape index: {}]   ;;  %s1392_s1 = inlined_call_operand.hbm [shape: f32[2,512], index: 1, kind: input, shape index: {}]   ;;  %s1393_s2 = inlined_call_operand.hbm [shape: f32[8,512], index: 2, kind: input, shape index: {}]   ;;  %s1394_s3 = inlined_call_operand.hbm [shape: f32[512,512], index: 3, kind: input, shape index: {}]   ;;  %s1395_s4 = inlined_call_operand.hbm [shape: f32[2,8], index: 4, kind: output, shape index: {}]  }
   0x1   :  { %10 = vsyncpa [#allocation7], 0 }
   0x2   :  { %11 = vsyncpa [#allocation10], 0 }
   0x3   :  { %12 = vsyncpa [#allocation5], 0  ;;  %s1278_s15 = smov [#allocation6]   ;;  %s1279_s17 = smov [#allocation3]  }
   0x4   :  { %s29_s16 = sshll.u32 %s1278_s15, 4  ;;  %s19_s18 = sshll.u32 %s1279_s17, 4  ;;  %s30_s16 = int_to_ptr.vmem [resolvable:$true] %s29_s16  ;;  %s20_s18 = int_to_ptr.vmem [resolvable:$true] %s19_s18 }
   0x5   :  { %s1160_s21 = scalar_lea.hbm %s1392_s1, 128 }
   0x6   :  { %p1161_p0 = scmp.ne.s32.totalorder %s1392_s1, %s1160_s21  ;;  %p1164_p1 = scmp.lt.u32.totalorder %s1160_s21, %s1392_s1 }
   0x8   :  { %p1166_p2 = pnand %p1164_p1, %p1161_p0 }
   0xa   :  { %1169 = shalt.err (!%p1166_p2)
}
   0xb   :  { %s1170_s26 = scalar_lea.vmem %s30_s16, 128  ;;  %p1175_p4 = scmp.lt.s32.totalorder %s30_s16, %s30_s16 }
   0xc   :  { %p1171_p3 = scmp.ne.s32.totalorder %s30_s16, %s1170_s26  ;;  %p1176_p5 = scmp.lt.s32.totalorder %s1170_s26, %s1170_s26 }
   0xe   :  { %p1177_p6 = por %p1176_p5, %p1175_p4 }
  0x10   :  { %p1178_p7 = pnand %p1177_p6, %p1171_p3 }
  0x12   :  { %1181 = shalt.err (!%p1178_p7)
}
  0x13   :  { %32 = dma.hbm_to_vmem [thread:$0]  %s1392_s1, 128, %s30_s16, [#allocation7]  }
  0x14   :  { %s1182_s5 = scalar_lea.hbm %s1391_s0, 128 }
  0x15   :  { %p1183_p8 = scmp.ne.s32.totalorder %s1391_s0, %s1182_s5  ;;  %p1186_p9 = scmp.lt.u32.totalorder %s1182_s5, %s1391_s0 }
  0x17   :  { %p1188_p10 = pnand %p1186_p9, %p1183_p8 }
  0x19   :  { %1191 = shalt.err (!%p1188_p10)
}
  0x1a   :  { %s1192_s10 = scalar_lea.vmem %s20_s18, 128  ;;  %p1197_p12 = scmp.lt.s32.totalorder %s20_s18, %s20_s18 }
  0x1b   :  { %p1193_p11 = scmp.ne.s32.totalorder %s20_s18, %s1192_s10  ;;  %p1198_p13 = scmp.lt.s32.totalorder %s1192_s10, %s1192_s10 }
  0x1d   :  { %p1199_p0 = por %p1198_p13, %p1197_p12 }
  0x1f   :  { %p1200_p1 = pnand %p1199_p0, %p1193_p11 }
  0x21   :  { %1203 = shalt.err (!%p1200_p1)
}
  0x22   :  { %22 = dma.hbm_to_vmem [thread:$0]  %s1391_s0, 128, %s20_s18, [#allocation4]  }
  0x23   :  { %s1280_s12 = smov [#allocation8]   ;;  %s1281_s14 = smov [#allocation9]  }
  0x24   :  { %s39_s13 = sshll.u32 %s1280_s12, 4  ;;  %s48_s15 = sshll.u32 %s1281_s14, 4  ;;  %s40_s13 = int_to_ptr.vmem [resolvable:$true] %s39_s13  ;;  %s1336_s15 = int_to_ptr.vmem [resolvable:$true] %s48_s15 }
  0x25   :  { %s1204_s19 = scalar_lea.hbm %s1393_s2, 512 }
  0x26   :  { %p1205_p2 = scmp.ne.s32.totalorder %s1393_s2, %s1204_s19  ;;  %p1208_p3 = scmp.lt.u32.totalorder %s1204_s19, %s1393_s2 }
  0x28   :  { %p1210_p4 = pnand %p1208_p3, %p1205_p2 }
  0x2a   :  { %1213 = shalt.err (!%p1210_p4)
}
  0x2b   :  { %s1214_s0 = scalar_lea.vmem %s40_s13, 512  ;;  %p1219_p6 = scmp.lt.s32.totalorder %s40_s13, %s40_s13 }
  0x2c   :  { %p1215_p5 = scmp.ne.s32.totalorder %s40_s13, %s1214_s0  ;;  %p1220_p7 = scmp.lt.s32.totalorder %s1214_s0, %s1214_s0 }
  0x2e   :  { %p1221_p8 = por %p1220_p7, %p1219_p6 }
  0x30   :  { %p1222_p9 = pnand %p1221_p8, %p1215_p5 }
  0x32   :  { %1225 = shalt.err (!%p1222_p9)
}
  0x33   :  { %42 = dma.hbm_to_vmem [thread:$0]  %s1393_s2, 512, %s40_s13, [#allocation7]  }
  0x34   :  { %s1226_s27 = scalar_lea.hbm %s1394_s3, 32768 }
  0x35   :  { %p1227_p10 = scmp.ne.s32.totalorder %s1394_s3, %s1226_s27  ;;  %p1230_p11 = scmp.lt.u32.totalorder %s1226_s27, %s1394_s3 }
  0x37   :  { %p1232_p12 = pnand %p1230_p11, %p1227_p10 }
  0x39   :  { %1235 = shalt.err (!%p1232_p12)
}
  0x3a   :  { %s1236_s6 = scalar_lea.vmem %s1336_s15, 32768  ;;  %p1241_p0 = scmp.lt.s32.totalorder %s1336_s15, %s1336_s15 }
  0x3b   :  { %p1237_p13 = scmp.ne.s32.totalorder %s1336_s15, %s1236_s6  ;;  %p1242_p1 = scmp.lt.s32.totalorder %s1236_s6, %s1236_s6 }
  0x3d   :  { %p1243_p2 = por %p1242_p1, %p1241_p0 }
  0x3f   :  { %p1244_p3 = pnand %p1243_p2, %p1237_p13 }
  0x41   :  { %1247 = shalt.err (!%p1244_p3)
}
  0x42   :  { %s1282_s2 = smov 512   ;;  %s1283_s7 = smov 32  }
  0x43   :  { %54 = dma.hbm_to_vmem [thread:$0]  %s1394_s3, 32768, %s1336_s15, [#allocation10], %s1282_s2, %s1282_s2, %s1283_s7  }
  0x44   :  { %1270 = dma.done.wait [#allocation4], 128  }
  0x45   :  { %1271 = vsyncadd [#allocation4], 4294967168 }
  0x46   :  { %1272 = dma.done.wait [#allocation7], 640  }
  0x47   :  { %1273 = vsyncadd [#allocation7], 4294966656 }
  0x48   :  { %1274 = dma.done.wait [#allocation10], 32768  }
  0x49   :  { %1275 = vsyncadd [#allocation10], 4294934528  ;;  %v1284_v0 = vmov 0.0   ;;  %v117_v1 = vld [vmem:[#allocation9 + $0x8] sm:$0xff]  ;;  %v119_v3 = vld [vmem:[#allocation9 + $0x18] sm:$0xff]  ;;  %vm684_vm0 = vcmask 1041408  }
  0x4a   :  { %97 = vst [vmem:[#allocation2 + $0x8] sm:$0xfc] %v1284_v0  ;;  %96 = vst [vmem:[#allocation2] sm:$0xfc] %v1284_v0  ;;  %v121_v2 = vld [vmem:[#allocation9 + $0x28] sm:$0xff]  ;;  %v123_v5 = vld [vmem:[#allocation9 + $0x38] sm:$0xff] }
  0x4b   :  { %98 = vst [vmem:[#allocation2 + $0x10] sm:$0xfc] %v1284_v0  ;;  %99 = vst [vmem:[#allocation2 + $0x18] sm:$0xfc] %v1284_v0  ;;  %v880_v4 = vpack.c.bf16 %v121_v2, %v117_v1  ;;  %v116_v6 = vld [vmem:[#allocation9] sm:$0xff]  ;;  %v1008_v8 = vpack.c.bf16 %v123_v5, %v119_v3  ;;  %v118_v10 = vld [vmem:[#allocation9 + $0x10] sm:$0xff] }
  0x4c   :  { %v120_v7 = vld [vmem:[#allocation9 + $0x20] sm:$0xff]  ;;  %v122_v11 = vld [vmem:[#allocation9 + $0x30] sm:$0xff]  ;;  %v125_v12 = vld [vmem:[#allocation9 + $0x48] sm:$0xff]  ;;  %vm854_vm1 = vcmask 58368   ;;  %s1286_s3 = smov [#allocation11]  }
  0x4d   :  { %v882_v9 = vpack.c.bf16 %v120_v7, %v116_v6  ;;  %881 = vmatprep.subr.bf16.mxu0 %v880_v4  ;;  %v1010_v13 = vpack.c.bf16 %v122_v11, %v118_v10  ;;  %v129_v14 = vld [vmem:[#allocation9 + $0x68] sm:$0xff]  ;;  %v127_v15 = vld [vmem:[#allocation9 + $0x58] sm:$0xff]  ;;  %1009 = vmatprep.subr.bf16.mxu1 %v1008_v8  ;;  %v124_v19 = vld [vmem:[#allocation9 + $0x40] sm:$0xff]  ;;  %s867_s10 = sshll.u32 %s1286_s3, 4  ;;  %s868_s10 = int_to_ptr.vmem [resolvable:$true] %s867_s10 }
  0x4e   :  { %v131_v16 = vld [vmem:[#allocation9 + $0x78] sm:$0xff]  ;;  %v884_v17 = vpack.c.bf16 %v129_v14, %v125_v12  ;;  %v128_v20 = vld [vmem:[#allocation9 + $0x60] sm:$0xff]  ;;  %v126_v21 = vld [vmem:[#allocation9 + $0x50] sm:$0xff]  ;;  %s1248_s1 = scalar_lea.vmem %s868_s10, 32  ;;  %p1253_p5 = scmp.lt.s32.totalorder %s868_s10, %s868_s10 }
  0x4f   :  { %883 = vmatpush1.bf16.msra.mxu0 %v882_v9  ;;  %v1012_v18 = vpack.c.bf16 %v131_v16, %v127_v15  ;;  %1011 = vmatpush1.bf16.msra.mxu1 %v1010_v13  ;;  %v886_v22 = vpack.c.bf16 %v128_v20, %v124_v19  ;;  %v130_v23 = vld [vmem:[#allocation9 + $0x70] sm:$0xff]  ;;  %v133_v24 = vld [vmem:[#allocation9 + $0x88] sm:$0xff]  ;;  %v135_v28 = vld [vmem:[#allocation9 + $0x98] sm:$0xff]  ;;  %p1249_p4 = scmp.ne.s32.totalorder %s868_s10, %s1248_s1  ;;  %p1254_p6 = scmp.lt.s32.totalorder %s1248_s1, %s1248_s1 }
  0x50   :  { %v137_v25 = vld [vmem:[#allocation9 + $0xa8] sm:$0xff]  ;;  %885 = vmatprep.subr.bf16.mxu0 %v884_v17  ;;  %v1014_v26 = vpack.c.bf16 %v130_v23, %v126_v21  ;;  %v139_v29 = vld [vmem:[#allocation9 + $0xb8] sm:$0xff]  ;;  %v132_v30 = vld [vmem:[#allocation9 + $0x80] sm:$0xff] }
  0x51   :  { %1013 = vmatprep.subr.bf16.mxu1 %v1012_v18  ;;  %v888_v27 = vpack.c.bf16 %v137_v25, %v133_v24  ;;  %v1016_v31 = vpack.c.bf16 %v139_v29, %v135_v28  ;;  %v136_v32 = vld [vmem:[#allocation9 + $0xa0] sm:$0xff]  ;;  %v134_v33 = vld [vmem:[#allocation9 + $0x90] sm:$0xff]  ;;  %v141_v36 = vld [vmem:[#allocation9 + $0xc8] sm:$0xff]  ;;  %p1255_p7 = por %p1254_p6, %p1253_p5 }
  0x52   :  { %v138_v34 = vld [vmem:[#allocation9 + $0xb0] sm:$0xff]  ;;  %v890_v35 = vpack.c.bf16 %v136_v32, %v132_v30  ;;  %v145_v37 = vld [vmem:[#allocation9 + $0xe8] sm:$0xff]  ;;  %v143_v38 = vld [vmem:[#allocation9 + $0xd8] sm:$0xff] }
  0x53   :  { %887 = vmatpush1.bf16.msra.mxu0 %v886_v22  ;;  %1015 = vmatpush1.bf16.msra.mxu1 %v1014_v26  ;;  %v1018_v39 = vpack.c.bf16 %v138_v34, %v134_v33  ;;  %v892_v40 = vpack.c.bf16 %v145_v37, %v141_v36  ;;  %v147_v41 = vld [vmem:[#allocation9 + $0xf8] sm:$0xff]  ;;  %v140_v42 = vld [vmem:[#allocation9 + $0xc0] sm:$0xff]  ;;  %v142_v45 = vld [vmem:[#allocation9 + $0xd0] sm:$0xff]  ;;  %p1256_p8 = pnand %p1255_p7, %p1249_p4 }
  0x54   :  { %889 = vmatprep.subr.bf16.mxu0 %v888_v27  ;;  %v144_v43 = vld [vmem:[#allocation9 + $0xe0] sm:$0xff]  ;;  %1017 = vmatprep.subr.bf16.mxu1 %v1016_v31  ;;  %v1020_v44 = vpack.c.bf16 %v147_v41, %v143_v38  ;;  %v146_v46 = vld [vmem:[#allocation9 + $0xf0] sm:$0xff]  ;;  %v149_v47 = vld [vmem:[#allocation9 + $0x108] sm:$0xff] }
  0x55   :  { %v153_v48 = vld [vmem:[#allocation9 + $0x128] sm:$0xff]  ;;  %v151_v49 = vld [vmem:[#allocation9 + $0x118] sm:$0xff]  ;;  %v894_v51 = vpack.c.bf16 %v144_v43, %v140_v42  ;;  %v1022_v52 = vpack.c.bf16 %v146_v46, %v142_v45  ;;  %v148_v54 = vld [vmem:[#allocation9 + $0x100] sm:$0xff] }
  0x56   :  { %v155_v50 = vld [vmem:[#allocation9 + $0x138] sm:$0xff]  ;;  %v896_v53 = vpack.c.bf16 %v153_v48, %v149_v47  ;;  %v152_v55 = vld [vmem:[#allocation9 + $0x120] sm:$0xff]  ;;  %v150_v56 = vld [vmem:[#allocation9 + $0x110] sm:$0xff] }
  0x57   :  { %891 = vmatpush1.bf16.msra.mxu0 %v890_v35  ;;  %1019 = vmatpush1.bf16.msra.mxu1 %v1018_v39  ;;  %v1024_v57 = vpack.c.bf16 %v155_v50, %v151_v49  ;;  %v154_v58 = vld [vmem:[#allocation9 + $0x130] sm:$0xff]  ;;  %v157_v59 = vld [vmem:[#allocation9 + $0x148] sm:$0xff]  ;;  %v159_v61 = vld [vmem:[#allocation9 + $0x158] sm:$0xff]  ;;  %v898_v63 = vpack.c.bf16 %v152_v55, %v148_v54 }
  0x58   :  { %893 = vmatprep.subr.bf16.mxu0 %v892_v40  ;;  %1021 = vmatprep.subr.bf16.mxu1 %v1020_v44  ;;  %v161_v60 = vld [vmem:[#allocation9 + $0x168] sm:$0xff]  ;;  %v163_v62 = vld [vmem:[#allocation9 + $0x178] sm:$0xff]  ;;  %v1026_v0 = vpack.c.bf16 %v154_v58, %v150_v56  ;;  %v156_v2 = vld [vmem:[#allocation9 + $0x140] sm:$0xff] }
  0x59   :  { %v900_v1 = vpack.c.bf16 %v161_v60, %v157_v59  ;;  %v160_v3 = vld [vmem:[#allocation9 + $0x160] sm:$0xff]  ;;  %v158_v4 = vld [vmem:[#allocation9 + $0x150] sm:$0xff]  ;;  %v1028_v5 = vpack.c.bf16 %v163_v62, %v159_v61  ;;  %v165_v7 = vld [vmem:[#allocation9 + $0x188] sm:$0xff]  ;;  %v75_v59 = vlaneseq }
  0x5a   :  { %v162_v6 = vld [vmem:[#allocation9 + $0x170] sm:$0xff]  ;;  %v169_v8 = vld [vmem:[#allocation9 + $0x1a8] sm:$0xff]  ;;  %v167_v9 = vld [vmem:[#allocation9 + $0x198] sm:$0xff]  ;;  %v902_v11 = vpack.c.bf16 %v160_v3, %v156_v2 }
  0x5b   :  { %895 = vmatpush1.bf16.msra.mxu0 %v894_v51  ;;  %1023 = vmatpush1.bf16.msra.mxu1 %v1022_v52  ;;  %v171_v10 = vld [vmem:[#allocation9 + $0x1b8] sm:$0xff]  ;;  %v1030_v12 = vpack.c.bf16 %v162_v6, %v158_v4  ;;  %v904_v13 = vpack.c.bf16 %v169_v8, %v165_v7  ;;  %v164_v14 = vld [vmem:[#allocation9 + $0x180] sm:$0xff]  ;;  %v166_v16 = vld [vmem:[#allocation9 + $0x190] sm:$0xff] }
  0x5c   :  { %897 = vmatprep.subr.bf16.mxu0 %v896_v53  ;;  %1025 = vmatprep.subr.bf16.mxu1 %v1024_v57  ;;  %v168_v15 = vld [vmem:[#allocation9 + $0x1a0] sm:$0xff]  ;;  %v1032_v17 = vpack.c.bf16 %v171_v10, %v167_v9  ;;  %v170_v18 = vld [vmem:[#allocation9 + $0x1b0] sm:$0xff]  ;;  %v173_v19 = vld [vmem:[#allocation9 + $0x1c8] sm:$0xff]  ;;  %v1285_v57 = vmov 1983009808   ;;  %v76_v9 = vshrl.u32 %v75_v59, 7 }
  0x5d   :  { %v177_v20 = vld [vmem:[#allocation9 + $0x1e8] sm:$0xff]  ;;  %v175_v21 = vld [vmem:[#allocation9 + $0x1d8] sm:$0xff]  ;;  %v906_v23 = vpack.c.bf16 %v168_v15, %v164_v14  ;;  %v1034_v24 = vpack.c.bf16 %v170_v18, %v166_v16  ;;  %v172_v26 = vld [vmem:[#allocation9 + $0x1c0] sm:$0xff]  ;;  %v73_v58 = vunpack.c.l.s4 %v1285_v57 }
  0x5e   :  { %v179_v22 = vld [vmem:[#allocation9 + $0x1f8] sm:$0xff]  ;;  %v908_v25 = vpack.c.bf16 %v177_v20, %v173_v19  ;;  %v176_v27 = vld [vmem:[#allocation9 + $0x1e0] sm:$0xff]  ;;  %v174_v28 = vld [vmem:[#allocation9 + $0x1d0] sm:$0xff] }
  0x5f   :  { %899 = vmatpush1.bf16.msra.mxu0 %v898_v63  ;;  %1027 = vmatpush1.bf16.msra.mxu1 %v1026_v0  ;;  %v1036_v29 = vpack.c.bf16 %v179_v22, %v175_v21  ;;  %v178_v30 = vld [vmem:[#allocation9 + $0x1f0] sm:$0xff]  ;;  %v181_v31 = vld [vmem:[#allocation9 + $0x208] sm:$0xff]  ;;  %v183_v33 = vld [vmem:[#allocation9 + $0x218] sm:$0xff]  ;;  %v910_v35 = vpack.c.bf16 %v176_v27, %v172_v26  ;;  %v74_v8 = vunpack.c.0.s8 %v73_v58 }
  0x60   :  { %901 = vmatprep.subr.bf16.mxu0 %v900_v1  ;;  %1029 = vmatprep.subr.bf16.mxu1 %v1028_v5  ;;  %v185_v32 = vld [vmem:[#allocation9 + $0x228] sm:$0xff]  ;;  %v187_v34 = vld [vmem:[#allocation9 + $0x238] sm:$0xff]  ;;  %v1038_v36 = vpack.c.bf16 %v178_v30, %v174_v28  ;;  %v180_v38 = vld [vmem:[#allocation9 + $0x200] sm:$0xff] }
  0x61   :  { %v912_v37 = vpack.c.bf16 %v185_v32, %v181_v31  ;;  %v184_v39 = vld [vmem:[#allocation9 + $0x220] sm:$0xff]  ;;  %v182_v40 = vld [vmem:[#allocation9 + $0x210] sm:$0xff]  ;;  %v1040_v41 = vpack.c.bf16 %v187_v34, %v183_v33  ;;  %v189_v43 = vld [vmem:[#allocation9 + $0x248] sm:$0xff] }
  0x62   :  { %v186_v42 = vld [vmem:[#allocation9 + $0x230] sm:$0xff]  ;;  %v193_v44 = vld [vmem:[#allocation9 + $0x268] sm:$0xff]  ;;  %v191_v45 = vld [vmem:[#allocation9 + $0x258] sm:$0xff]  ;;  %v914_v47 = vpack.c.bf16 %v184_v39, %v180_v38 }
  0x63   :  { %903 = vmatpush1.bf16.msra.mxu0 %v902_v11  ;;  %1031 = vmatpush1.bf16.msra.mxu1 %v1030_v12  ;;  %v195_v46 = vld [vmem:[#allocation9 + $0x278] sm:$0xff]  ;;  %v1042_v48 = vpack.c.bf16 %v186_v42, %v182_v40  ;;  %v916_v49 = vpack.c.bf16 %v193_v44, %v189_v43  ;;  %v188_v50 = vld [vmem:[#allocation9 + $0x240] sm:$0xff]  ;;  %v190_v52 = vld [vmem:[#allocation9 + $0x250] sm:$0xff] }
  0x64   :  { %905 = vmatprep.subr.bf16.mxu0 %v904_v13  ;;  %1033 = vmatprep.subr.bf16.mxu1 %v1032_v17  ;;  %v192_v51 = vld [vmem:[#allocation9 + $0x260] sm:$0xff]  ;;  %v1044_v53 = vpack.c.bf16 %v195_v46, %v191_v45  ;;  %v194_v54 = vld [vmem:[#allocation9 + $0x270] sm:$0xff]  ;;  %v197_v55 = vld [vmem:[#allocation9 + $0x288] sm:$0xff] }
  0x65   :  { %v201_v56 = vld [vmem:[#allocation9 + $0x2a8] sm:$0xff]  ;;  %v199_v60 = vld [vmem:[#allocation9 + $0x298] sm:$0xff]  ;;  %v918_v62 = vpack.c.bf16 %v192_v51, %v188_v50  ;;  %v1046_v63 = vpack.c.bf16 %v194_v54, %v190_v52  ;;  %v196_v1 = vld [vmem:[#allocation9 + $0x280] sm:$0xff] }
  0x66   :  { %v203_v61 = vld [vmem:[#allocation9 + $0x2b8] sm:$0xff]  ;;  %v920_v0 = vpack.c.bf16 %v201_v56, %v197_v55  ;;  %v200_v2 = vld [vmem:[#allocation9 + $0x2a0] sm:$0xff]  ;;  %v198_v3 = vld [vmem:[#allocation9 + $0x290] sm:$0xff] }
  0x67   :  { %907 = vmatpush1.bf16.msra.mxu0 %v906_v23  ;;  %1035 = vmatpush1.bf16.msra.mxu1 %v1034_v24  ;;  %v1048_v4 = vpack.c.bf16 %v203_v61, %v199_v60  ;;  %v202_v5 = vld [vmem:[#allocation9 + $0x2b0] sm:$0xff]  ;;  %v205_v6 = vld [vmem:[#allocation9 + $0x2c8] sm:$0xff]  ;;  %v207_v10 = vld [vmem:[#allocation9 + $0x2d8] sm:$0xff]  ;;  %v922_v12 = vpack.c.bf16 %v200_v2, %v196_v1  ;;  %v77_v23 = vsub.s32 %v74_v8, %v76_v9 }
  0x68   :  { %909 = vmatprep.subr.bf16.mxu0 %v908_v25  ;;  %1037 = vmatprep.subr.bf16.mxu1 %v1036_v29  ;;  %v209_v7 = vld [vmem:[#allocation9 + $0x2e8] sm:$0xff]  ;;  %v211_v11 = vld [vmem:[#allocation9 + $0x2f8] sm:$0xff]  ;;  %v204_v13 = vld [vmem:[#allocation9 + $0x2c0] sm:$0xff]  ;;  %v1050_v14 = vpack.c.bf16 %v202_v5, %v198_v3 }
  0x69   :  { %v924_v15 = vpack.c.bf16 %v209_v7, %v205_v6  ;;  %v208_v16 = vld [vmem:[#allocation9 + $0x2e0] sm:$0xff]  ;;  %v206_v17 = vld [vmem:[#allocation9 + $0x2d0] sm:$0xff]  ;;  %v1052_v19 = vpack.c.bf16 %v211_v11, %v207_v10  ;;  %v213_v20 = vld [vmem:[#allocation9 + $0x308] sm:$0xff] }
  0x6a   :  { %v210_v18 = vld [vmem:[#allocation9 + $0x2f0] sm:$0xff]  ;;  %v217_v21 = vld [vmem:[#allocation9 + $0x328] sm:$0xff]  ;;  %v215_v24 = vld [vmem:[#allocation9 + $0x318] sm:$0xff]  ;;  %v926_v27 = vpack.c.bf16 %v208_v16, %v204_v13 }
  0x6b   :  { %911 = vmatpush1.bf16.msra.mxu0 %v910_v35  ;;  %1039 = vmatpush1.bf16.msra.mxu1 %v1038_v36  ;;  %v67_v22 = vld [vmem:[#allocation3] sm:$0xff]  ;;  %v219_v25 = vld [vmem:[#allocation9 + $0x338] sm:$0xff]  ;;  %v1054_v29 = vpack.c.bf16 %v210_v18, %v206_v17  ;;  %v928_v30 = vpack.c.bf16 %v217_v21, %v213_v20  ;;  %v212_v31 = vld [vmem:[#allocation9 + $0x300] sm:$0xff] }
  0x6c   :  { %913 = vmatprep.subr.bf16.mxu0 %v912_v37  ;;  %1041 = vmatprep.subr.bf16.mxu1 %v1040_v41  ;;  %v68_v26 = vld [vmem:[#allocation6] sm:$0xff]  ;;  %v216_v32 = vld [vmem:[#allocation9 + $0x320] sm:$0xff]  ;;  %v214_v33 = vld [vmem:[#allocation9 + $0x310] sm:$0xff]  ;;  %v1056_v34 = vpack.c.bf16 %v219_v25, %v215_v24 }
  0x6d   :  { %v69_v28 = vadd.f32 %v68_v26, %v67_v22  ;;  %v218_v35 = vld [vmem:[#allocation9 + $0x330] sm:$0xff]  ;;  %v221_v36 = vld [vmem:[#allocation9 + $0x348] sm:$0xff]  ;;  %v223_v40 = vld [vmem:[#allocation9 + $0x358] sm:$0xff]  ;;  %v930_v42 = vpack.c.bf16 %v216_v32, %v212_v31 }
  0x6e   :  { %v225_v37 = vld [vmem:[#allocation9 + $0x368] sm:$0xff]  ;;  %v227_v41 = vld [vmem:[#allocation9 + $0x378] sm:$0xff]  ;;  %v1058_v45 = vpack.c.bf16 %v218_v35, %v214_v33  ;;  %v226_v51 = vld [vmem:[#allocation9 + $0x370] sm:$0xff] }
  0x6f   :  { %915 = vmatpush1.bf16.msra.mxu0 %v914_v47  ;;  %1043 = vmatpush1.bf16.msra.mxu1 %v1042_v48  ;;  %v78_v38 = vrot.slane %v69_v28, %v77_v23  ;;  %878 = vst.sshfl [vmem:[#allocation2] sm:$0x3 pattern:$0x76325410] %v69_v28  ;;  %v71_v39 = vcombine.high %v69_v28, %v69_v28  ;;  %v220_v47 = vld [vmem:[#allocation9 + $0x340] sm:$0xff]  ;;  %v229_v52 = vld [vmem:[#allocation9 + $0x388] sm:$0xff] }
  0x70   :  { %917 = vmatprep.subr.bf16.mxu0 %v916_v49  ;;  %1045 = vmatprep.subr.bf16.mxu1 %v1044_v53  ;;  %v932_v46 = vpack.c.bf16 %v225_v37, %v221_v36  ;;  %v224_v48 = vld [vmem:[#allocation9 + $0x360] sm:$0xff]  ;;  %v222_v49 = vld [vmem:[#allocation9 + $0x350] sm:$0xff]  ;;  %v1060_v50 = vpack.c.bf16 %v227_v41, %v223_v40  ;;  %v233_v53 = vld [vmem:[#allocation9 + $0x3a8] sm:$0xff] }
  0x71   :  { %v86_v43 = vcombine.high %v78_v38, %v78_v38  ;;  %v85_v44 = vrot.slane %v71_v39, %v77_v23  ;;  %879 = vst.sshfl [vmem:[#allocation2 + $0x10] sm:$0x3 pattern:$0x76325410] %v71_v39  ;;  %v231_v55 = vld [vmem:[#allocation9 + $0x398] sm:$0xff]  ;;  %v934_v57 = vpack.c.bf16 %v224_v48, %v220_v47  ;;  %v1062_v58 = vpack.c.bf16 %v226_v51, %v222_v49  ;;  %v228_v60 = vld [vmem:[#allocation9 + $0x380] sm:$0xff] }
  0x72   :  { %v235_v56 = vld [vmem:[#allocation9 + $0x3b8] sm:$0xff]  ;;  %v936_v59 = vpack.c.bf16 %v233_v53, %v229_v52  ;;  %v232_v61 = vld [vmem:[#allocation9 + $0x3a0] sm:$0xff]  ;;  %v237_v1 = vld [vmem:[#allocation9 + $0x3c8] sm:$0xff] }
  0x73   :  { %919 = vmatpush1.bf16.msra.mxu0 %v918_v62  ;;  %1047 = vmatpush1.bf16.msra.mxu1 %v1046_v63  ;;  %93 = vst [vmem:[#allocation2 + $0x8] sm:$0x3] %v86_v43  ;;  %v87_v54 = vcombine.high %v85_v44, %v85_v44  ;;  %v230_v62 = vld [vmem:[#allocation9 + $0x390] sm:$0xff]  ;;  %v1064_v63 = vpack.c.bf16 %v235_v56, %v231_v55  ;;  %v241_v2 = vld [vmem:[#allocation9 + $0x3e8] sm:$0xff]  ;;  %v239_v3 = vld [vmem:[#allocation9 + $0x3d8] sm:$0xff] }
  0x74   :  { %921 = vmatprep.subr.bf16.mxu0 %v920_v0  ;;  %1049 = vmatprep.subr.bf16.mxu1 %v1048_v4  ;;  %v234_v0 = vld [vmem:[#allocation9 + $0x3b0] sm:$0xff]  ;;  %v243_v4 = vld [vmem:[#allocation9 + $0x3f8] sm:$0xff]  ;;  %v938_v5 = vpack.c.bf16 %v232_v61, %v228_v60  ;;  %v236_v6 = vld [vmem:[#allocation9 + $0x3c0] sm:$0xff]  ;;  %v940_v8 = vpack.c.bf16 %v241_v2, %v237_v1 }
  0x75   :  { %95 = vst [vmem:[#allocation2 + $0x18] sm:$0x3] %v87_v54  ;;  %v1066_v7 = vpack.c.bf16 %v234_v0, %v230_v62  ;;  %v240_v9 = vld [vmem:[#allocation9 + $0x3e0] sm:$0xff]  ;;  %v238_v10 = vld [vmem:[#allocation9 + $0x3d0] sm:$0xff]  ;;  %v247_v16 = vld [vmem:[#allocation9 + $0x418] sm:$0xff] }
  0x76   :  { %v242_v13 = vld [vmem:[#allocation9 + $0x3f0] sm:$0xff]  ;;  %v251_v17 = vld [vmem:[#allocation9 + $0x438] sm:$0xff]  ;;  %v942_v18 = vpack.c.bf16 %v240_v9, %v236_v6  ;;  %v244_v21 = vld [vmem:[#allocation9 + $0x400] sm:$0xff] }
  0x77   :  { %923 = vmatpush1.bf16.msra.mxu0 %v922_v12  ;;  %1051 = vmatpush1.bf16.msra.mxu1 %v1050_v14  ;;  %v1068_v12 = vpack.c.bf16 %v243_v4, %v239_v3  ;;  %v245_v14 = vld [vmem:[#allocation9 + $0x408] sm:$0xff]  ;;  %v248_v22 = vld [vmem:[#allocation9 + $0x420] sm:$0xff]  ;;  %v246_v23 = vld [vmem:[#allocation9 + $0x410] sm:$0xff]  ;;  %v1072_v24 = vpack.c.bf16 %v251_v17, %v247_v16 }
  0x78   :  { %925 = vmatprep.subr.bf16.mxu0 %v924_v15  ;;  %1053 = vmatprep.subr.bf16.mxu1 %v1052_v19  ;;  %v249_v15 = vld [vmem:[#allocation9 + $0x428] sm:$0xff]  ;;  %v1070_v19 = vpack.c.bf16 %v242_v13, %v238_v10  ;;  %v250_v25 = vld [vmem:[#allocation9 + $0x430] sm:$0xff]  ;;  %v255_v28 = vld [vmem:[#allocation9 + $0x458] sm:$0xff]  ;;  %v946_v31 = vpack.c.bf16 %v248_v22, %v244_v21 }
  0x79   :  { %v944_v20 = vpack.c.bf16 %v249_v15, %v245_v14  ;;  %v253_v26 = vld [vmem:[#allocation9 + $0x448] sm:$0xff]  ;;  %v1074_v32 = vpack.c.bf16 %v250_v25, %v246_v23  ;;  %v256_v35 = vld [vmem:[#allocation9 + $0x460] sm:$0xff]  ;;  %v254_v36 = vld [vmem:[#allocation9 + $0x450] sm:$0xff] }
  0x7a   :  { %v109_v11 = vld [vmem:[#allocation2 + $0x8] sm:$0xff]  ;;  %v258_v38 = vld [vmem:[#allocation9 + $0x470] sm:$0xff]  ;;  %v261_v39 = vld [vmem:[#allocation9 + $0x488] sm:$0xff] }
  0x7b   :  { %927 = vmatpush1.bf16.msra.mxu0 %v926_v27  ;;  %1055 = vmatpush1.bf16.msra.mxu1 %v1054_v29  ;;  %v257_v27 = vld [vmem:[#allocation9 + $0x468] sm:$0xff]  ;;  %v259_v29 = vld [vmem:[#allocation9 + $0x478] sm:$0xff]  ;;  %v1078_v44 = vpack.c.bf16 %v258_v38, %v254_v36  ;;  %v264_v47 = vld [vmem:[#allocation9 + $0x4a0] sm:$0xff] }
  0x7c   :  { %929 = vmatprep.subr.bf16.mxu0 %v928_v30  ;;  %1057 = vmatprep.subr.bf16.mxu1 %v1056_v34  ;;  %v108_v30 = vld [vmem:[#allocation2] sm:$0xff]  ;;  %v948_v33 = vpack.c.bf16 %v257_v27, %v253_v26  ;;  %v252_v34 = vld [vmem:[#allocation9 + $0x440] sm:$0xff]  ;;  %v1076_v37 = vpack.c.bf16 %v259_v29, %v255_v28  ;;  %v265_v40 = vld [vmem:[#allocation9 + $0x4a8] sm:$0xff] }
  0x7d   :  { %436 = vmatprep.mubr.f32.mxu0 %v109_v11  ;;  %590 = vmatprep.mubr.f32.mxu1 %v109_v11  ;;  %v263_v41 = vld [vmem:[#allocation9 + $0x498] sm:$0xff]  ;;  %v950_v43 = vpack.c.bf16 %v256_v35, %v252_v34  ;;  %v262_v48 = vld [vmem:[#allocation9 + $0x490] sm:$0xff]  ;;  %v269_v51 = vld [vmem:[#allocation9 + $0x4c8] sm:$0xff] }
  0x7e   :  { %v273_v52 = vld [vmem:[#allocation9 + $0x4e8] sm:$0xff]  ;;  %v271_v53 = vld [vmem:[#allocation9 + $0x4d8] sm:$0xff]  ;;  %v270_v60 = vld [vmem:[#allocation9 + $0x4d0] sm:$0xff] }
  0x7f   :  { %931 = vmatpush1.bf16.msra.mxu0 %v930_v42  ;;  %1059 = vmatpush1.bf16.msra.mxu1 %v1058_v45  ;;  %v267_v42 = vld [vmem:[#allocation9 + $0x4b8] sm:$0xff]  ;;  %v952_v45 = vpack.c.bf16 %v265_v40, %v261_v39  ;;  %v274_v62 = vld [vmem:[#allocation9 + $0x4f0] sm:$0xff]  ;;  %v281_v0 = vld [vmem:[#allocation9 + $0x528] sm:$0xff] }
  0x80   :  { %933 = vmatprep.subr.bf16.mxu0 %v932_v46  ;;  %1061 = vmatprep.subr.bf16.mxu1 %v1060_v50  ;;  %v260_v46 = vld [vmem:[#allocation9 + $0x480] sm:$0xff]  ;;  %v1080_v49 = vpack.c.bf16 %v267_v42, %v263_v41  ;;  %v266_v50 = vld [vmem:[#allocation9 + $0x4b0] sm:$0xff]  ;;  %v275_v54 = vld [vmem:[#allocation9 + $0x4f8] sm:$0xff]  ;;  %v1086_v4 = vpack.c.bf16 %v274_v62, %v270_v60 }
  0x81   :  { %v954_v55 = vpack.c.bf16 %v264_v47, %v260_v46  ;;  %v1082_v56 = vpack.c.bf16 %v266_v50, %v262_v48  ;;  %v1084_v61 = vpack.c.bf16 %v275_v54, %v271_v53  ;;  %v279_v1 = vld [vmem:[#allocation9 + $0x518] sm:$0xff]  ;;  %v276_v6 = vld [vmem:[#allocation9 + $0x500] sm:$0xff]  ;;  %v282_v10 = vld [vmem:[#allocation9 + $0x530] sm:$0xff] }
  0x82   :  { %v283_v2 = vld [vmem:[#allocation9 + $0x538] sm:$0xff]  ;;  %v285_v11 = vld [vmem:[#allocation9 + $0x548] sm:$0xff]  ;;  %v290_v22 = vld [vmem:[#allocation9 + $0x570] sm:$0xff] }
  0x83   :  { %935 = vmatpush1.bf16.msra.mxu0 %v934_v57  ;;  %1063 = vmatpush1.bf16.msra.mxu1 %v1062_v58  ;;  %v956_v57 = vpack.c.bf16 %v273_v52, %v269_v51  ;;  %v268_v58 = vld [vmem:[#allocation9 + $0x4c0] sm:$0xff]  ;;  %v1088_v9 = vpack.c.bf16 %v283_v2, %v279_v1  ;;  %v287_v13 = vld [vmem:[#allocation9 + $0x558] sm:$0xff]  ;;  %v293_v23 = vld [vmem:[#allocation9 + $0x588] sm:$0xff] }
  0x84   :  { %937 = vmatprep.subr.bf16.mxu0 %v936_v59  ;;  %1065 = vmatprep.subr.bf16.mxu1 %v1064_v63  ;;  %v272_v59 = vld [vmem:[#allocation9 + $0x4e0] sm:$0xff]  ;;  %v277_v63 = vld [vmem:[#allocation9 + $0x508] sm:$0xff]  ;;  %v291_v14 = vld [vmem:[#allocation9 + $0x578] sm:$0xff] }
  0x85   :  { %v958_v3 = vpack.c.bf16 %v272_v59, %v268_v58  ;;  %v1092_v21 = vpack.c.bf16 %v291_v14, %v287_v13  ;;  %v295_v25 = vld [vmem:[#allocation9 + $0x598] sm:$0xff]  ;;  %v101_v28 = vld [vmem:[#allocation8 + $0x8] sm:$0xff]  ;;  %v100_v29 = vld [vmem:[#allocation8] sm:$0xff] }
  0x86   :  { %v299_v26 = vld [vmem:[#allocation9 + $0x5b8] sm:$0xff]  ;;  %v294_v34 = vld [vmem:[#allocation9 + $0x590] sm:$0xff]  ;;  %v305_v38 = vld [vmem:[#allocation9 + $0x5e8] sm:$0xff] }
  0x87   :  { %939 = vmatpush1.bf16.msra.mxu0 %v938_v5  ;;  %1067 = vmatpush1.bf16.msra.mxu1 %v1066_v7  ;;  %v960_v5 = vpack.c.bf16 %v281_v0, %v277_v63  ;;  %v280_v7 = vld [vmem:[#allocation9 + $0x520] sm:$0xff]  ;;  %v1096_v35 = vpack.c.bf16 %v299_v26, %v295_v25  ;;  %v298_v36 = vld [vmem:[#allocation9 + $0x5b0] sm:$0xff]  ;;  %v303_v39 = vld [vmem:[#allocation9 + $0x5d8] sm:$0xff] }
  0x88   :  { %941 = vmatprep.subr.bf16.mxu0 %v940_v8  ;;  %1069 = vmatprep.subr.bf16.mxu1 %v1068_v12  ;;  %v278_v8 = vld [vmem:[#allocation9 + $0x510] sm:$0xff]  ;;  %v289_v12 = vld [vmem:[#allocation9 + $0x568] sm:$0xff]  ;;  %v962_v15 = vpack.c.bf16 %v280_v7, %v276_v6  ;;  %v307_v40 = vld [vmem:[#allocation9 + $0x5f8] sm:$0xff] }
  0x89   :  { %v1090_v16 = vpack.c.bf16 %v282_v10, %v278_v8  ;;  %v964_v17 = vpack.c.bf16 %v289_v12, %v285_v11  ;;  %v111_v41 = vld [vmem:[#allocation2 + $0x18] sm:$0xff]  ;;  %v300_v47 = vld [vmem:[#allocation9 + $0x5c0] sm:$0xff]  ;;  %v1100_v50 = vpack.c.bf16 %v307_v40, %v303_v39  ;;  %v306_v51 = vld [vmem:[#allocation9 + $0x5f0] sm:$0xff] }
  0x8a   :  { %v304_v48 = vld [vmem:[#allocation9 + $0x5e0] sm:$0xff]  ;;  %v309_v52 = vld [vmem:[#allocation9 + $0x608] sm:$0xff]  ;;  %v311_v54 = vld [vmem:[#allocation9 + $0x618] sm:$0xff] }
  0x8b   :  { %943 = vmatpush1.bf16.msra.mxu0 %v942_v18  ;;  %1071 = vmatpush1.bf16.msra.mxu1 %v1070_v19  ;;  %v284_v18 = vld [vmem:[#allocation9 + $0x540] sm:$0xff]  ;;  %v313_v53 = vld [vmem:[#allocation9 + $0x628] sm:$0xff]  ;;  %v314_v63 = vld [vmem:[#allocation9 + $0x630] sm:$0xff] }
  0x8c   :  { %945 = vmatprep.subr.bf16.mxu0 %v944_v20  ;;  %1073 = vmatprep.subr.bf16.mxu1 %v1072_v24  ;;  %v288_v19 = vld [vmem:[#allocation9 + $0x560] sm:$0xff]  ;;  %v286_v20 = vld [vmem:[#allocation9 + $0x550] sm:$0xff]  ;;  %v297_v24 = vld [vmem:[#allocation9 + $0x5a8] sm:$0xff]  ;;  %v976_v58 = vpack.c.bf16 %v313_v53, %v309_v52 }
  0x8d   :  { %v966_v27 = vpack.c.bf16 %v288_v19, %v284_v18  ;;  %v308_v59 = vld [vmem:[#allocation9 + $0x600] sm:$0xff]  ;;  %v317_v0 = vld [vmem:[#allocation9 + $0x648] sm:$0xff]  ;;  %v319_v2 = vld [vmem:[#allocation9 + $0x658] sm:$0xff] }
  0x8e   :  { %437 = vmatmul.mubr.f32.vlgmr.msra.gmra.mrb[0].mxu0 %v108_v30  ;;  %591 = vmatmul.mubr.f32.vlgmr.msra.gmra.mrb[0].mxu1 %v108_v30  ;;  %v1094_v30 = vpack.c.bf16 %v290_v22, %v286_v20  ;;  %v312_v60 = vld [vmem:[#allocation9 + $0x620] sm:$0xff]  ;;  %v321_v1 = vld [vmem:[#allocation9 + $0x668] sm:$0xff]  ;;  %v322_v11 = vld [vmem:[#allocation9 + $0x670] sm:$0xff] }
  0x8f   :  { %947 = vmatpush1.bf16.msra.mxu0 %v946_v31  ;;  %1075 = vmatpush1.bf16.msra.mxu1 %v1074_v32  ;;  %v968_v31 = vpack.c.bf16 %v297_v24, %v293_v23  ;;  %v292_v32 = vld [vmem:[#allocation9 + $0x580] sm:$0xff]  ;;  %v980_v6 = vpack.c.bf16 %v321_v1, %v317_v0  ;;  %v325_v12 = vld [vmem:[#allocation9 + $0x688] sm:$0xff]  ;;  %v327_v14 = vld [vmem:[#allocation9 + $0x698] sm:$0xff] }
  0x90   :  { %949 = vmatprep.subr.bf16.mxu0 %v948_v33  ;;  %1077 = vmatprep.subr.bf16.mxu1 %v1076_v37  ;;  %v296_v33 = vld [vmem:[#allocation9 + $0x5a0] sm:$0xff]  ;;  %v301_v37 = vld [vmem:[#allocation9 + $0x5c8] sm:$0xff]  ;;  %v330_v23 = vld [vmem:[#allocation9 + $0x6b0] sm:$0xff] }
  0x91   :  { %442 = vmatprep.mubr.f32.mxu0 %v101_v28  ;;  %596 = vmatprep.mubr.f32.mxu1 %v101_v28  ;;  %v970_v42 = vpack.c.bf16 %v296_v33, %v292_v32  ;;  %v972_v46 = vpack.c.bf16 %v305_v38, %v301_v37  ;;  %v316_v7 = vld [vmem:[#allocation9 + $0x640] sm:$0xff]  ;;  %v329_v13 = vld [vmem:[#allocation9 + $0x6a8] sm:$0xff]  ;;  %v335_v26 = vld [vmem:[#allocation9 + $0x6d8] sm:$0xff] }
  0x92   :  { %443 = vmatmul.mubr.f32.gmra.mrb[2].mxu0 %v100_v29  ;;  %597 = vmatmul.mubr.f32.gmra.mrb[2].mxu1 %v100_v29  ;;  %v320_v8 = vld [vmem:[#allocation9 + $0x660] sm:$0xff]  ;;  %v984_v18 = vpack.c.bf16 %v329_v13, %v325_v12  ;;  %v333_v24 = vld [vmem:[#allocation9 + $0x6c8] sm:$0xff]  ;;  %v334_v33 = vld [vmem:[#allocation9 + $0x6d0] sm:$0xff] }
  0x93   :  { %951 = vmatpush1.bf16.msra.mxu0 %v950_v43  ;;  %1079 = vmatpush1.bf16.msra.mxu1 %v1078_v44  ;;  %v1367_v43 = vld [vmem:[#allocation8 + $0x18] sm:$0xff]  ;;  %v1369_v44 = vld [vmem:[#allocation8 + $0x10] sm:$0xff]  ;;  %v324_v19 = vld [vmem:[#allocation9 + $0x680] sm:$0xff] }
  0x94   :  { %953 = vmatprep.subr.bf16.mxu0 %v952_v45  ;;  %1081 = vmatprep.subr.bf16.mxu1 %v1080_v49  ;;  %v1098_v45 = vpack.c.bf16 %v298_v36, %v294_v34  ;;  %v302_v49 = vld [vmem:[#allocation9 + $0x5d0] sm:$0xff]  ;;  %v328_v20 = vld [vmem:[#allocation9 + $0x6a0] sm:$0xff]  ;;  %v337_v25 = vld [vmem:[#allocation9 + $0x6e8] sm:$0xff] }
  0x95   :  { %513 = vmatprep.mubr.f32.mxu0 %v111_v41  ;;  %667 = vmatprep.mubr.f32.mxu1 %v111_v41  ;;  %v986_v28 = vpack.c.bf16 %v328_v20, %v324_v19  ;;  %v336_v32 = vld [vmem:[#allocation9 + $0x6e0] sm:$0xff]  ;;  %v341_v36 = vld [vmem:[#allocation9 + $0x708] sm:$0xff]  ;;  %v343_v38 = vld [vmem:[#allocation9 + $0x718] sm:$0xff] }
  0x96   :  { %v345_v37 = vld [vmem:[#allocation9 + $0x728] sm:$0xff]  ;;  %v347_v39 = vld [vmem:[#allocation9 + $0x738] sm:$0xff]  ;;  %v366_v20 = vld [vmem:[#allocation9 + $0x7d0] sm:$0xff] }
  0x97   :  { %955 = vmatpush1.bf16.msra.mxu0 %v954_v55  ;;  %1083 = vmatpush1.bf16.msra.mxu1 %v1082_v56  ;;  %v315_v55 = vld [vmem:[#allocation9 + $0x638] sm:$0xff]  ;;  %v974_v56 = vpack.c.bf16 %v304_v48, %v300_v47  ;;  %v342_v47 = vld [vmem:[#allocation9 + $0x710] sm:$0xff]  ;;  %v1120_v48 = vpack.c.bf16 %v347_v39, %v343_v38 }
  0x98   :  { %957 = vmatprep.subr.bf16.mxu0 %v956_v57  ;;  %1085 = vmatprep.subr.bf16.mxu1 %v1084_v61  ;;  %v1102_v57 = vpack.c.bf16 %v306_v51, %v302_v49  ;;  %v310_v61 = vld [vmem:[#allocation9 + $0x610] sm:$0xff]  ;;  %v1104_v62 = vpack.c.bf16 %v315_v55, %v311_v54  ;;  %v353_v51 = vld [vmem:[#allocation9 + $0x768] sm:$0xff]  ;;  %v351_v52 = vld [vmem:[#allocation9 + $0x758] sm:$0xff] }
  0x99   :  { %v346_v49 = vld [vmem:[#allocation9 + $0x730] sm:$0xff]  ;;  %v355_v53 = vld [vmem:[#allocation9 + $0x778] sm:$0xff] }
  0x9a   :  { %v1122_v55 = vpack.c.bf16 %v346_v49, %v342_v47  ;;  %v359_v0 = vld [vmem:[#allocation9 + $0x798] sm:$0xff] }
  0x9b   :  { %959 = vmatpush1.bf16.msra.mxu0 %v958_v3  ;;  %1087 = vmatpush1.bf16.msra.mxu1 %v1086_v4  ;;  %v323_v3 = vld [vmem:[#allocation9 + $0x678] sm:$0xff]  ;;  %v978_v4 = vpack.c.bf16 %v312_v60, %v308_v59  ;;  %v350_v59 = vld [vmem:[#allocation9 + $0x750] sm:$0xff]  ;;  %v1124_v60 = vpack.c.bf16 %v355_v53, %v351_v52 }
  0x9c   :  { %961 = vmatprep.subr.bf16.mxu0 %v960_v5  ;;  %1089 = vmatprep.subr.bf16.mxu1 %v1088_v9  ;;  %v1106_v5 = vpack.c.bf16 %v314_v63, %v310_v61  ;;  %v318_v9 = vld [vmem:[#allocation9 + $0x650] sm:$0xff]  ;;  %v1108_v10 = vpack.c.bf16 %v323_v3, %v319_v2  ;;  %v361_v63 = vld [vmem:[#allocation9 + $0x7a8] sm:$0xff]  ;;  %v363_v1 = vld [vmem:[#allocation9 + $0x7b8] sm:$0xff] }
  0x9d   :  { %v354_v61 = vld [vmem:[#allocation9 + $0x770] sm:$0xff]  ;;  %v367_v12 = vld [vmem:[#allocation9 + $0x7d8] sm:$0xff] }
  0x9e   :  { %v1126_v3 = vpack.c.bf16 %v354_v61, %v350_v59  ;;  %v371_v13 = vld [vmem:[#allocation9 + $0x7f8] sm:$0xff] }
  0x9f   :  { %963 = vmatpush1.bf16.msra.mxu0 %v962_v15  ;;  %1091 = vmatpush1.bf16.msra.mxu1 %v1090_v16  ;;  %v331_v15 = vld [vmem:[#allocation9 + $0x6b8] sm:$0xff]  ;;  %v982_v16 = vpack.c.bf16 %v320_v8, %v316_v7  ;;  %v358_v7 = vld [vmem:[#allocation9 + $0x790] sm:$0xff]  ;;  %v1128_v8 = vpack.c.bf16 %v363_v1, %v359_v0  ;;  %v1132_v19 = vpack.c.bf16 %v371_v13, %v367_v12 }
  0xa0   :  { %965 = vmatprep.subr.bf16.mxu0 %v964_v17  ;;  %1093 = vmatprep.subr.bf16.mxu1 %v1092_v21  ;;  %v1110_v17 = vpack.c.bf16 %v322_v11, %v318_v9  ;;  %v326_v21 = vld [vmem:[#allocation9 + $0x690] sm:$0xff]  ;;  %v1112_v22 = vpack.c.bf16 %v331_v15, %v327_v14  ;;  %v369_v11 = vld [vmem:[#allocation9 + $0x7e8] sm:$0xff] }
  0xa1   :  { %v1114_v29 = vpack.c.bf16 %v330_v23, %v326_v21  ;;  %v362_v9 = vld [vmem:[#allocation9 + $0x7b0] sm:$0xff] }
  0xa2   :  { %v1130_v15 = vpack.c.bf16 %v362_v9, %v358_v7  ;;  %v370_v21 = vld [vmem:[#allocation9 + $0x7f0] sm:$0xff] }
  0xa3   :  { %967 = vmatpush1.bf16.msra.mxu0 %v966_v27  ;;  %1095 = vmatpush1.bf16.msra.mxu1 %v1094_v30  ;;  %v339_v27 = vld [vmem:[#allocation9 + $0x6f8] sm:$0xff]  ;;  %v988_v30 = vpack.c.bf16 %v337_v25, %v333_v24  ;;  %v1134_v23 = vpack.c.bf16 %v370_v21, %v366_v20  ;;  %v110_v24 = vld [vmem:[#allocation2 + $0x10] sm:$0xff] }
  0xa4   :  { %969 = vmatprep.subr.bf16.mxu0 %v968_v31  ;;  %1097 = vmatprep.subr.bf16.mxu1 %v1096_v35  ;;  %v332_v31 = vld [vmem:[#allocation9 + $0x6c0] sm:$0xff]  ;;  %v1116_v34 = vpack.c.bf16 %v339_v27, %v335_v26  ;;  %v338_v35 = vld [vmem:[#allocation9 + $0x6f0] sm:$0xff] }
  0xa5   :  { %v990_v40 = vpack.c.bf16 %v336_v32, %v332_v31  ;;  %v1118_v41 = vpack.c.bf16 %v338_v35, %v334_v33 }
  0xa7   :  { %971 = vmatpush1.bf16.msra.mxu0 %v970_v42  ;;  %1099 = vmatpush1.bf16.msra.mxu1 %v1098_v45  ;;  %v992_v42 = vpack.c.bf16 %v345_v37, %v341_v36  ;;  %v340_v45 = vld [vmem:[#allocation9 + $0x700] sm:$0xff] }
  0xa8   :  { %973 = vmatprep.subr.bf16.mxu0 %v972_v46  ;;  %1101 = vmatprep.subr.bf16.mxu1 %v1100_v50  ;;  %v344_v46 = vld [vmem:[#allocation9 + $0x720] sm:$0xff]  ;;  %v349_v50 = vld [vmem:[#allocation9 + $0x748] sm:$0xff] }
  0xa9   :  { %v994_v54 = vpack.c.bf16 %v344_v46, %v340_v45 }
  0xab   :  { %975 = vmatpush1.bf16.msra.mxu0 %v974_v56  ;;  %1103 = vmatpush1.bf16.msra.mxu1 %v1102_v57  ;;  %v996_v56 = vpack.c.bf16 %v353_v51, %v349_v50  ;;  %v348_v57 = vld [vmem:[#allocation9 + $0x740] sm:$0xff] }
  0xac   :  { %977 = vmatprep.subr.bf16.mxu0 %v976_v58  ;;  %1105 = vmatprep.subr.bf16.mxu1 %v1104_v62  ;;  %v352_v58 = vld [vmem:[#allocation9 + $0x760] sm:$0xff]  ;;  %v357_v62 = vld [vmem:[#allocation9 + $0x788] sm:$0xff] }
  0xad   :  { %v998_v2 = vpack.c.bf16 %v352_v58, %v348_v57 }
  0xaf   :  { %979 = vmatpush1.bf16.msra.mxu0 %v978_v4  ;;  %1107 = vmatpush1.bf16.msra.mxu1 %v1106_v5  ;;  %v1000_v4 = vpack.c.bf16 %v361_v63, %v357_v62  ;;  %v356_v5 = vld [vmem:[#allocation9 + $0x780] sm:$0xff] }
  0xb0   :  { %981 = vmatprep.subr.bf16.mxu0 %v980_v6  ;;  %1109 = vmatprep.subr.bf16.mxu1 %v1108_v10  ;;  %v360_v6 = vld [vmem:[#allocation9 + $0x7a0] sm:$0xff]  ;;  %v365_v10 = vld [vmem:[#allocation9 + $0x7c8] sm:$0xff] }
  0xb1   :  { %v1002_v14 = vpack.c.bf16 %v360_v6, %v356_v5 }
  0xb3   :  { %983 = vmatpush1.bf16.msra.mxu0 %v982_v16  ;;  %1111 = vmatpush1.bf16.msra.mxu1 %v1110_v17  ;;  %v1004_v16 = vpack.c.bf16 %v369_v11, %v365_v10  ;;  %v364_v17 = vld [vmem:[#allocation9 + $0x7c0] sm:$0xff] }
  0xb4   :  { %985 = vmatprep.subr.bf16.mxu0 %v984_v18  ;;  %1113 = vmatprep.subr.bf16.mxu1 %v1112_v22  ;;  %v368_v18 = vld [vmem:[#allocation9 + $0x7e0] sm:$0xff] }
  0xb5   :  { %v1006_v22 = vpack.c.bf16 %v368_v18, %v364_v17 }
  0xb7   :  { %987 = vmatpush1.bf16.msra.mxu0 %v986_v28  ;;  %1115 = vmatpush1.bf16.msra.mxu1 %v1114_v29 }
  0xb8   :  { %989 = vmatprep.subr.bf16.mxu0 %v988_v30  ;;  %1117 = vmatprep.subr.bf16.mxu1 %v1116_v34 }
  0xbb   :  { %991 = vmatpush1.bf16.msra.mxu0 %v990_v40  ;;  %1119 = vmatpush1.bf16.msra.mxu1 %v1118_v41 }
  0xbc   :  { %993 = vmatprep.subr.bf16.mxu0 %v992_v42  ;;  %1121 = vmatprep.subr.bf16.mxu1 %v1120_v48 }
  0xbf   :  { %995 = vmatpush1.bf16.msra.mxu0 %v994_v54  ;;  %1123 = vmatpush1.bf16.msra.mxu1 %v1122_v55 }
  0xc0   :  { %997 = vmatprep.subr.bf16.mxu0 %v996_v56  ;;  %1125 = vmatprep.subr.bf16.mxu1 %v1124_v60 }
  0xc3   :  { %999 = vmatpush1.bf16.msra.mxu0 %v998_v2  ;;  %1127 = vmatpush1.bf16.msra.mxu1 %v1126_v3 }
  0xc4   :  { %1001 = vmatprep.subr.bf16.mxu0 %v1000_v4  ;;  %1129 = vmatprep.subr.bf16.mxu1 %v1128_v8 }
  0xc7   :  { %1003 = vmatpush1.bf16.msra.mxu0 %v1002_v14  ;;  %1131 = vmatpush1.bf16.msra.mxu1 %v1130_v15 }
  0xc8   :  { %1005 = vmatprep.subr.bf16.mxu0 %v1004_v16  ;;  %1133 = vmatprep.subr.bf16.mxu1 %v1132_v19 }
  0xcb   :  { %1007 = vmatpush1.bf16.msra.mxu0 %v1006_v22  ;;  %1135 = vmatpush1.bf16.msra.mxu1 %v1134_v23 }
  0xce   :  { %514 = vmatmul.mubr.f32.vlgmr.msra.gmra.mrb[0].mxu0 %v110_v24  ;;  %668 = vmatmul.mubr.f32.vlgmr.msra.gmra.mrb[0].mxu1 %v110_v24 }
  0xcf   :  { %519 = vmatprep.mubr.f32.mxu0 %v1367_v43  ;;  %673 = vmatprep.mubr.f32.mxu1 %v1367_v43 }
  0xd2   :  { %520 = vmatmul.mubr.f32.gmra.mrb[2].mxu0 %v1369_v44  ;;  %674 = vmatmul.mubr.f32.gmra.mrb[2].mxu1 %v1369_v44 }
 0x1a1   :  { %v515_v25 = vpop.f32.mrb[0].mxu0  ;;  %v669_v27 = vpop.f32.mrb[0].mxu1 }
 0x1a2   :  { %v680_v26 = vmul.f32 %v515_v25, %v515_v25  ;;  %v517_v28 = vpop.f32.mrb[1].mxu0  ;;  %v682_v29 = vmul.f32 %v669_v27, %v669_v27  ;;  %v671_v31 = vpop.f32.mrb[1].mxu1 }
 0x1a3   :  { %v681_v30 = vmul.f32 %v517_v28, %v517_v28  ;;  %v683_v34 = vmul.f32 %v671_v31, %v671_v31 }
 0x1a4   :  { %v685_v32 = vsel %vm684_vm0, %v680_v26, 0.0  ;;  %v688_v44 = vsel %vm684_vm0, %v682_v29, 0.0 }
 0x1a5   :  { %v686_v33 = vsel %vm684_vm0, %v681_v30, 0.0  ;;  %v521_v35 = vpop.f32.mrb[2].mxu0  ;;  %v675_v37 = vpop.f32.mrb[2].mxu1  ;;  %v690_v46 = vsel %vm684_vm0, %v683_v34, 0.0 }
 0x1a6   :  { %v687_v36 = vadd.f32 %v686_v33, %v685_v32  ;;  %v699_v43 = vmul.f32 %v521_v35, %v521_v35  ;;  %v523_v38 = vpop.f32.mrb[3].mxu0  ;;  %v677_v40 = vpop.f32.mrb[3].mxu1  ;;  %v701_v42 = vmul.f32 %v675_v37, %v675_v37 }
 0x1a7   :  { %v700_v39 = vmul.f32 %v523_v38, %v523_v38  ;;  %v702_v48 = vmul.f32 %v677_v40, %v677_v40 }
 0x1a8   :  { %v689_v41 = vadd.f32 %v688_v44, %v687_v36 }
 0x1a9   :  { %v703_v45 = vadd.f32 %v700_v39, %v699_v43 }
 0x1aa   :  { %v691_v47 = vadd.f32 %v690_v46, %v689_v41 }
 0x1ab   :  { %v704_v49 = vadd.f32 %v703_v45, %v701_v42 }
 0x1ad   :  { %v705_v50 = vadd.f32 %v704_v49, %v702_v48 }
 0x1af   :  { %706 = vadd.xlane.f32.xlu0 %v705_v50 }
 0x1b3   :  { %692 = vadd.xlane.f32.xlu0 %v691_v47 }
 0x23c   :  { %v707_v51 = vpop.xlane.xlu0 %706 }
 0x23d   :  { %1154 = vrsqrt.f32 %v707_v51 }
 0x240   :  { %v693_v52 = vpop.xlane.xlu0 %692 }
 0x241   :  { %1156 = vrsqrt.f32 %v693_v52 }
 0x247   :  { %v1155_v53 = vpop.eup %1154 }
 0x248   :  { %v710_v54 = vmul.f32 %v1155_v53, %v523_v38  ;;  %v712_v55 = vmul.f32 %v1155_v53, %v677_v40  ;;  %v709_v56 = vmul.f32 %v1155_v53, %v521_v35  ;;  %v711_v57 = vmul.f32 %v1155_v53, %v675_v37 }
 0x24a   :  { %713 = vmatprep.subr.mxu1 %v710_v54  ;;  %783 = vmatprep.subr.mxu0 %v712_v55 }
 0x24b   :  { %v1157_v58 = vpop.eup %1156  ;;  %714 = vmatpush1.xpose.msra.mxu1 %v709_v56  ;;  %784 = vmatpush1.xpose.msra.mxu0 %v711_v57 }
 0x24c   :  { %v696_v59 = vmul.f32 %v1157_v58, %v517_v28  ;;  %v698_v60 = vmul.f32 %v1157_v58, %v671_v31  ;;  %v695_v61 = vmul.f32 %v1157_v58, %v515_v25  ;;  %v697_v62 = vmul.f32 %v1157_v58, %v669_v27 }
 0x24e   :  { %777 = vmatprep.mubr.f32.mxu1 %v696_v59  ;;  %847 = vmatprep.mubr.f32.mxu0 %v698_v60 }
 0x24f   :  { %778 = vmatmul.mubr.f32.vlgmr.msra.gmra.mrb[4].mxu1 %v695_v61  ;;  %848 = vmatmul.mubr.f32.vlgmr.msra.gmra.mrb[4].mxu0 %v697_v62 }
 0x322   :  { %v779_v63 = vpop.f32.mrb[4].mxu1  ;;  %v849_v0 = vpop.f32.mrb[4].mxu0 }
 0x323   :  { %v850_v1 = vadd.f32 %v849_v0, %v779_v63  ;;  %v781_v2 = vpop.f32.mrb[5].mxu1  ;;  %v851_v3 = vpop.f32.mrb[5].mxu0 }
 0x325   :  { %v853_v4 = vmul.f32 %v850_v1, %v850_v1 }
 0x327   :  { %v855_v5 = vsel %vm854_vm1, %v853_v4, 0.0 }
 0x328   :  { %856 = vadd.xlane.f32.xlu1 %v855_v5 }
 0x3b5   :  { %v857_v6 = vpop.xlane.xlu1 %856 }
 0x3b6   :  { %1158 = vrsqrt.f32 %v857_v6 }
 0x3c0   :  { %v1159_v7 = vpop.eup %1158 }
 0x3c1   :  { %v859_v8 = vmul.f32 %v1159_v7, %v850_v1 }
 0x3c3   :  { %860 = vst.msk [vmem:[#allocation11] sm:$0x3] %vm854_vm1, %v859_v8 }
 0x3c4   :  { %1259 = shalt.err (!%p1256_p8)
}
 0x3c5   :  { %s1260_s13 = scalar_lea.hbm %s1395_s4, 32 }
 0x3c6   :  { %p1261_p9 = scmp.ne.s32.totalorder %s1395_s4, %s1260_s13  ;;  %p1264_p10 = scmp.lt.u32.totalorder %s1260_s13, %s1395_s4 }
 0x3c8   :  { %p1266_p11 = pnand %p1264_p10, %p1261_p9 }
 0x3ca   :  { %1269 = shalt.err (!%p1266_p11)
}
 0x3cb   :  { %870 = dma.vmem_to_hbm [thread:$0]  %s868_s10, 32, %s1395_s4, [#allocation5]  }
 0x3cc   :  { %1276 = dma.done.wait [#allocation5], 32  }
 0x3cd   :  { %1277 = vsyncadd [#allocation5], 4294967264 }
 0x3ce   :  { %874 = vsyncpa [#allocation4], 1 }
 0x3cf   :  { %875 = vsyncpa [#allocation7], 1 }
 0x3d0   :  { %876 = vsyncpa [#allocation10], 1 }
 0x3d1   :  { %877 = vsyncpa [#allocation5], 1 }

</bundles_post_ra>
